<compile_context>
chip_gen: v7x
topology: tpu7x:2x2x1
jax: 0.10.0
libtpu: 0.0.40
codegen_flags: <defaults>
</compile_context>

<pallas_src>
import functools

import jax
import jax.numpy as jnp
from jax.experimental import pallas as pl
from jax.experimental.pallas import tpu as pltpu


# ----------------------------- Pallas kernel ------------------------------
def hybrid_embed_kernel(row0_ref, row1_ref, w_ref, b_ref, out_ref):
    """One output row (Wf tokens) of the fused conv3x3/s2 + linear projection.

    row0_ref: (1, 1, Wc, 4C)  phase-decomposed coarse input row h      (compute dtype)
    row1_ref: (1, 1, Wc, 4C)  phase-decomposed coarse input row h + 1  (halo)
    w_ref   : (4, 4C, E)      fused (conv @ proj) weights, one slab per (dh, dw) shift
    b_ref   : (1, E)          fused bias (float32)
    out_ref : (1, 1, Wf, E)   output tokens for this (batch, output-row) grid step
    """
    _, _, Wf, _ = out_ref.shape
    acc = None
    for dh in range(2):
        src = row0_ref if dh == 0 else row1_ref
        for dw in range(2):
            lhs = src[0, 0, dw:dw + Wf, :]                        # (Wf, 4C)
            d = jnp.dot(lhs, w_ref[dh * 2 + dw],
                        preferred_element_type=jnp.float32)       # (Wf, E) f32 acc
            acc = d if acc is None else acc + d
    out_ref[0, 0] = (acc + b_ref[...]).astype(out_ref.dtype)


# ------------------------------ host wrapper ------------------------------
@functools.partial(jax.jit, static_argnames=("compute_dtype", "out_dtype"))
def hybrid_embed(x, wc, bc, wp, bp, *, compute_dtype=jnp.bfloat16, out_dtype=None):
    """x: (B, C, H, W) NCHW.  wc: (F, C, 3, 3), bc: (F,), wp: (E, F), bp: (E,).
    Returns (B, num_patches, E) == proj(backbone(x)).flatten(2).transpose(1, 2)."""
    B, C, H, W = x.shape
    F = wc.shape[0]
    E = wp.shape[0]
    assert wc.shape[2:] == (3, 3), "synthetic backbone stem is a 3x3/s2/p1 conv"
    if out_dtype is None:
        out_dtype = x.dtype
    C4 = 4 * C

    # Output spatial size of the 3x3 / stride-2 / pad-1 stem.
    Hf = (H + 2 - 3) // 2 + 1
    Wf = (W + 2 - 3) // 2 + 1

    # ---- fuse conv + proj in float32 (exact up to fp reassociation) ----
    wc_mat = wc.astype(jnp.float32).transpose(0, 2, 3, 1).reshape(F, 9 * C)  # cols (kh,kw,c)
    wp_mat = wp.astype(jnp.float32).T                                        # (F, E)
    w_fused = (wc_mat.T @ wp_mat).reshape(3, 3, C, E)                        # (kh, kw, c, e)
    b_fused = (bc.astype(jnp.float32) @ wp_mat
               + bp.astype(jnp.float32)).reshape(1, E)                       # (1, E) f32

    # One (4C, E) slab per coarse shift (dh, dw); row order (ph, pw, c) matches the
    # phase-decomposed input layout.  Invalid taps (kh or kw == 3) stay zero.
    slabs = []
    for dh in range(2):
        for dw in range(2):
            slab = jnp.zeros((2, 2, C, E), jnp.float32)          # (ph, pw, c, e)
            for ph in range(2):
                for pw in range(2):
                    kh, kw = 2 * dh + ph, 2 * dw + pw
                    if kh < 3 and kw < 3:
                        slab = slab.at[ph, pw].set(w_fused[kh, kw])
            slabs.append(slab.reshape(C4, E))
    w_shift = jnp.stack(slabs, axis=0).astype(compute_dtype)                 # (4, 4C, E)

    # ---- single fused producer: cast FIRST -> NHWC -> pad -> stride-2 space-to-depth
    xh = jnp.transpose(x.astype(compute_dtype), (0, 2, 3, 1))                # (B, H, W, C)
    Hp = -2 * (-(H + 2) // 2)            # H + 2 rounded up to even
    Wp = -2 * (-(W + 2) // 2)
    xp = jnp.pad(xh, ((0, 0), (1, Hp - H - 1), (1, Wp - W - 1), (0, 0)))
    Hc, Wc = Hp // 2, Wp // 2            # == Hf + 1, Wf + 1
    xs = (xp.reshape(B, Hc, 2, Wc, 2, C)
            .transpose(0, 1, 3, 2, 4, 5)
            .reshape(B, Hc, Wc, C4))                                         # (B, Hc, Wc, 4C)

    # Advisory cost: actual (unpadded) work of the 4 shift matmuls + real HBM bytes.
    flops = 2 * B * Hf * 4 * Wf * C4 * E
    bytes_accessed = (2 * B * Hf * Wc * C4 * jnp.dtype(compute_dtype).itemsize  # rows + halo
                      + 4 * C4 * E * jnp.dtype(compute_dtype).itemsize
                      + E * 4
                      + B * Hf * Wf * E * jnp.dtype(out_dtype).itemsize)

    # TODO(synk): for very large feature maps, tile several output rows per grid step
    # (loop over them in-kernel) to amortize the ~0.35us per-step overhead; at these
    # sizes the one-output-row tile keeps every block a full-extent 2D slab.
    out = pl.pallas_call(
        hybrid_embed_kernel,
        out_shape=jax.ShapeDtypeStruct((B, Hf, Wf, E), out_dtype),
        grid=(B, Hf),
        in_specs=[
            # coarse input row h and its 1-row halo (h + 1); same array, two specs
            pl.BlockSpec((1, 1, Wc, C4), lambda b, h: (b, h, 0, 0)),
            pl.BlockSpec((1, 1, Wc, C4), lambda b, h: (b, h + 1, 0, 0)),
            # Grid-invariant fused weights / bias (< 8 KiB total): never re-DMA'd; no
            # K/E tiling or single-buffering needed, even against v7x's 64 MiB VMEM.
            pl.BlockSpec((4, C4, E), lambda b, h: (0, 0, 0)),
            pl.BlockSpec((1, E), lambda b, h: (0, 0)),
        ],
        out_specs=pl.BlockSpec((1, 1, Wf, E), lambda b, h: (b, h, 0, 0)),
        compiler_params=pltpu.CompilerParams(
            dimension_semantics=("parallel", "parallel"),  # B*Hf steps -> both v7x TCs
            vmem_limit_bytes=32 * 1024 * 1024,
        ),
        cost_estimate=pl.CostEstimate(flops=flops, transcendentals=0,
                                      bytes_accessed=bytes_accessed),
    )(xs, xs, w_shift, b_fused)

    # Contiguous reshape only (no slice, no pad to strip): tokens ordered (oh*Wf + ow),
    # identical to backbone(x).flatten(2).transpose(1, 2).
    return out.reshape(B, Hf * Wf, E)


# --------------------------- pure-JAX reference ---------------------------
def hybrid_embed_ref(x, wc, bc, wp, bp):
    feat = jax.lax.conv_general_dilated(
        x, wc, window_strides=(2, 2), padding=((1, 1), (1, 1)),
        dimension_numbers=("NCHW", "OIHW", "NCHW"))
    feat = feat + bc.reshape(1, -1, 1, 1)
    B, F, Hf, Wf = feat.shape
    tok = feat.reshape(B, F, Hf * Wf).transpose(0, 2, 1)   # flatten(2).transpose(1,2)
    return jnp.einsum("bnf,ef->bne", tok, wp) + bp.reshape(1, 1, -1)


# --------------------------------- main -----------------------------------
if __name__ == "__main__":
    # Small synthetic config consistent with HybridEmbed:
    #   backbone = Conv2d(in_chans=4 -> feature_dim=16, k=3, s=2, p=1)
    #   img_size=16 -> feature_size=8x8 -> num_patches=64, embed_dim=32
    # TODO(synk): an arbitrary CNN backbone (and its torch.no_grad feature-size probe)
    # has no single-kernel Pallas equivalent; only this conv-stem backbone is modeled.
    B, C, H, W = 2, 4, 16, 16
    feature_dim, embed_dim = 16, 32

    key = jax.random.PRNGKey(0)
    kx, kwc, kbc, kwp, kbp = jax.random.split(key, 5)
    x = jax.random.normal(kx, (B, C, H, W), dtype=jnp.float32)
    wc = 0.1 * jax.random.normal(kwc, (feature_dim, C, 3, 3), dtype=jnp.float32)
    bc = 0.1 * jax.random.normal(kbc, (feature_dim,), dtype=jnp.float32)
    wp = 0.1 * jax.random.normal(kwp, (embed_dim, feature_dim), dtype=jnp.float32)
    bp = 0.1 * jax.random.normal(kbp, (embed_dim,), dtype=jnp.float32)

    ref = hybrid_embed_ref(x, wc, bc, wp, bp)

    # Default path: bf16 operands, f32 accumulation (bandwidth-optimal on v5e/v6e/v7x).
    out_bf16 = jax.block_until_ready(hybrid_embed(x, wc, bc, wp, bp))
    assert out_bf16.shape == (B, 64, embed_dim), out_bf16.shape
    assert jnp.allclose(out_bf16, ref, atol=2e-2, rtol=2e-2), \
        float(jnp.max(jnp.abs(out_bf16 - ref)))

    # f32 path (exact up to fp reassociation of the fused affine chain).
    out_f32 = jax.block_until_ready(
        hybrid_embed(x, wc, bc, wp, bp, compute_dtype=jnp.float32))
    assert out_f32.shape == (B, 64, embed_dim), out_f32.shape
    assert jnp.allclose(out_f32, ref, atol=1e-4, rtol=1e-4), \
        float(jnp.max(jnp.abs(out_f32 - ref)))

    print("KERNEL_OK")
</pallas_src>

<mosaic_0001>
module attributes {stable_mosaic.version = 11 : i64} {
  func.func @hybrid_embed_kernel(%arg0: i32, %arg1: i32, %arg2: memref<1x1x9x16xbf16, #tpu.memory_space<vmem>>, %arg3: memref<1x1x9x16xbf16, #tpu.memory_space<vmem>>, %arg4: memref<4x16x32xbf16, #tpu.memory_space<vmem>>, %arg5: memref<1x32xf32, #tpu.memory_space<vmem>>, %arg6: memref<1x1x8x32xf32, #tpu.memory_space<vmem>>) attributes {dimension_semantics = [#tpu.dimension_semantics<parallel>, #tpu.dimension_semantics<parallel>], iteration_bounds = array<i64: 2, 8>, scalar_prefetch = 0 : i64, scratch_operands = 0 : i64, tpu.core_type = #tpu.core_type<tc>, window_params = [{transform_indices = @transform_0, window_bounds = array<i64: 1, 1, 9, 16>}, {transform_indices = @transform_1, window_bounds = array<i64: 1, 1, 9, 16>}, {pipeline_mode = #tpu.pipeline_mode<synchronous>, transform_indices = @transform_2, window_bounds = array<i64: 4, 16, 32>}, {pipeline_mode = #tpu.pipeline_mode<synchronous>, transform_indices = @transform_3, window_bounds = array<i64: 1, 32>}, {transform_indices = @transform_4, window_bounds = array<i64: 1, 1, 8, 32>}]} {
    %c0 = arith.constant 0 : index
    %c0_0 = arith.constant 0 : index
    %c0_1 = arith.constant 0 : index
    %c0_2 = arith.constant 0 : index
    %0 = vector.load %arg2[%c0, %c0_0, %c0_1, %c0_2] : memref<1x1x9x16xbf16, #tpu.memory_space<vmem>>, vector<1x1x8x16xbf16>
    %1 = vector.shape_cast %0 : vector<1x1x8x16xbf16> to vector<8x16xbf16>
    %c0_3 = arith.constant 0 : index
    %c0_4 = arith.constant 0 : index
    %c0_5 = arith.constant 0 : index
    %2 = vector.load %arg4[%c0_3, %c0_4, %c0_5] : memref<4x16x32xbf16, #tpu.memory_space<vmem>>, vector<1x16x32xbf16>
    %3 = vector.shape_cast %2 : vector<1x16x32xbf16> to vector<16x32xbf16>
    %cst = arith.constant dense<0.000000e+00> : vector<8x32xf32>
    %4 = tpu.matmul %1, %3, %cst {dimension_numbers = #tpu.dot_dimension_numbers<[1], [0], [0], [1], [0, 0, 1, 1], [], []>} : vector<8x16xbf16>, vector<16x32xbf16>, vector<8x32xf32> -> vector<8x32xf32>
    %c0_6 = arith.constant 0 : index
    %c0_7 = arith.constant 0 : index
    %c1 = arith.constant 1 : index
    %c0_8 = arith.constant 0 : index
    %5 = vector.load %arg2[%c0_6, %c0_7, %c1, %c0_8] : memref<1x1x9x16xbf16, #tpu.memory_space<vmem>>, vector<1x1x8x16xbf16>
    %6 = vector.shape_cast %5 : vector<1x1x8x16xbf16> to vector<8x16xbf16>
    %c1_9 = arith.constant 1 : index
    %c0_10 = arith.constant 0 : index
    %c0_11 = arith.constant 0 : index
    %7 = vector.load %arg4[%c1_9, %c0_10, %c0_11] : memref<4x16x32xbf16, #tpu.memory_space<vmem>>, vector<1x16x32xbf16>
    %8 = vector.shape_cast %7 : vector<1x16x32xbf16> to vector<16x32xbf16>
    %cst_12 = arith.constant dense<0.000000e+00> : vector<8x32xf32>
    %9 = tpu.matmul %6, %8, %cst_12 {dimension_numbers = #tpu.dot_dimension_numbers<[1], [0], [0], [1], [0, 0, 1, 1], [], []>} : vector<8x16xbf16>, vector<16x32xbf16>, vector<8x32xf32> -> vector<8x32xf32>
    %10 = arith.addf %4, %9 : vector<8x32xf32>
    %c0_13 = arith.constant 0 : index
    %c0_14 = arith.constant 0 : index
    %c0_15 = arith.constant 0 : index
    %c0_16 = arith.constant 0 : index
    %11 = vector.load %arg3[%c0_13, %c0_14, %c0_15, %c0_16] : memref<1x1x9x16xbf16, #tpu.memory_space<vmem>>, vector<1x1x8x16xbf16>
    %12 = vector.shape_cast %11 : vector<1x1x8x16xbf16> to vector<8x16xbf16>
    %c2 = arith.constant 2 : index
    %c0_17 = arith.constant 0 : index
    %c0_18 = arith.constant 0 : index
    %13 = vector.load %arg4[%c2, %c0_17, %c0_18] : memref<4x16x32xbf16, #tpu.memory_space<vmem>>, vector<1x16x32xbf16>
    %14 = vector.shape_cast %13 : vector<1x16x32xbf16> to vector<16x32xbf16>
    %cst_19 = arith.constant dense<0.000000e+00> : vector<8x32xf32>
    %15 = tpu.matmul %12, %14, %cst_19 {dimension_numbers = #tpu.dot_dimension_numbers<[1], [0], [0], [1], [0, 0, 1, 1], [], []>} : vector<8x16xbf16>, vector<16x32xbf16>, vector<8x32xf32> -> vector<8x32xf32>
    %16 = arith.addf %10, %15 : vector<8x32xf32>
    %c0_20 = arith.constant 0 : index
    %c0_21 = arith.constant 0 : index
    %c1_22 = arith.constant 1 : index
    %c0_23 = arith.constant 0 : index
    %17 = vector.load %arg3[%c0_20, %c0_21, %c1_22, %c0_23] : memref<1x1x9x16xbf16, #tpu.memory_space<vmem>>, vector<1x1x8x16xbf16>
    %18 = vector.shape_cast %17 : vector<1x1x8x16xbf16> to vector<8x16xbf16>
    %c3 = arith.constant 3 : index
    %c0_24 = arith.constant 0 : index
    %c0_25 = arith.constant 0 : index
    %19 = vector.load %arg4[%c3, %c0_24, %c0_25] : memref<4x16x32xbf16, #tpu.memory_space<vmem>>, vector<1x16x32xbf16>
    %20 = vector.shape_cast %19 : vector<1x16x32xbf16> to vector<16x32xbf16>
    %cst_26 = arith.constant dense<0.000000e+00> : vector<8x32xf32>
    %21 = tpu.matmul %18, %20, %cst_26 {dimension_numbers = #tpu.dot_dimension_numbers<[1], [0], [0], [1], [0, 0, 1, 1], [], []>} : vector<8x16xbf16>, vector<16x32xbf16>, vector<8x32xf32> -> vector<8x32xf32>
    %22 = arith.addf %16, %21 : vector<8x32xf32>
    %c0_27 = arith.constant 0 : index
    %c0_28 = arith.constant 0 : index
    %23 = vector.load %arg5[%c0_27, %c0_28] : memref<1x32xf32, #tpu.memory_space<vmem>>, vector<1x32xf32>
    %24 = vector.broadcast %23 : vector<1x32xf32> to vector<8x32xf32>
    %25 = arith.addf %22, %24 : vector<8x32xf32>
    %c0_29 = arith.constant 0 : index
    %c0_30 = arith.constant 0 : index
    %c0_31 = arith.constant 0 : index
    %c0_32 = arith.constant 0 : index
    %26 = vector.load %arg6[%c0_29, %c0_30, %c0_31, %c0_32] : memref<1x1x8x32xf32, #tpu.memory_space<vmem>>, vector<1x1x8x32xf32>
    %27 = vector.shape_cast %26 : vector<1x1x8x32xf32> to vector<8x32xf32>
    %28 = vector.shape_cast %25 : vector<8x32xf32> to vector<1x1x8x32xf32>
    tpu.vector_store %arg6[%c0_29, %c0_30, %c0_31, %c0_32], %28 {strides = array<i32>} : memref<1x1x8x32xf32, #tpu.memory_space<vmem>>, vector<1x1x8x32xf32>,
    return
  }
  func.func @transform_0(%arg0: i32, %arg1: i32) -> (i32, i32, i32, i32) {
    %c0_i32 = arith.constant 0 : i32
    %c0_i32_0 = arith.constant 0 : i32
    %c0_i32_1 = arith.constant 0 : i32
    return %arg0, %arg1, %c0_i32, %c0_i32_0 : i32, i32, i32, i32
  }
  func.func @transform_1(%arg0: i32, %arg1: i32) -> (i32, i32, i32, i32) {
    %c1_i32 = arith.constant 1 : i32
    %0 = arith.addi %arg1, %c1_i32 : i32
    %c0_i32 = arith.constant 0 : i32
    %c0_i32_0 = arith.constant 0 : i32
    %c0_i32_1 = arith.constant 0 : i32
    return %arg0, %0, %c0_i32, %c0_i32_0 : i32, i32, i32, i32
  }
  func.func @transform_2(%arg0: i32, %arg1: i32) -> (i32, i32, i32) {
    %c0_i32 = arith.constant 0 : i32
    %c0_i32_0 = arith.constant 0 : i32
    %c0_i32_1 = arith.constant 0 : i32
    %c0_i32_2 = arith.constant 0 : i32
    return %c0_i32, %c0_i32_0, %c0_i32_1 : i32, i32, i32
  }
  func.func @transform_3(%arg0: i32, %arg1: i32) -> (i32, i32) {
    %c0_i32 = arith.constant 0 : i32
    %c0_i32_0 = arith.constant 0 : i32
    %c0_i32_1 = arith.constant 0 : i32
    return %c0_i32, %c0_i32_0 : i32, i32
  }
  func.func @transform_4(%arg0: i32, %arg1: i32) -> (i32, i32, i32, i32) {
    %c0_i32 = arith.constant 0 : i32
    %c0_i32_0 = arith.constant 0 : i32
    %c0_i32_1 = arith.constant 0 : i32
    return %arg0, %arg1, %c0_i32, %c0_i32_0 : i32, i32, i32, i32
  }
}

</mosaic_0001>

<bundles_post_ra>
// kernel: hybrid_embed.1
= control target key start
LH: loop header
LB: loop body
LE: loop exit
PB: predicated region body
PF: predicated region fallthrough
CT: control target
= control target key end

     0   :  { %s811_s15 = smov 0   ;;  %s813_s16 = smov 0   ;;  %s899_s0 = inlined_call_operand.vmem [shape: bf16[2,9,9,16], index: 0, kind: input, shape index: {}, may-alias: {0,1}]   ;;  %s900_s1 = inlined_call_operand.vmem [shape: bf16[2,9,9,16], index: 1, kind: input, shape index: {}, may-alias: {0,1}]   ;;  %s901_s2 = inlined_call_operand.vmem [shape: bf16[4,16,32], index: 2, kind: input, shape index: {}]   ;;  %s902_s3 = inlined_call_operand.vmem [shape: f32[1,32], index: 3, kind: input, shape index: {}]   ;;  %s903_s4 = inlined_call_operand.vmem [shape: f32[2,8,8,32], index: 4, kind: output, shape index: {}]  }
   0x1   :  { %s815_s17 = smov 0   ;;  %s817_s18 = smov 0  }
   0x2   :  { %s819_s19 = smov 0  }
   0x3 LB: > { %s23_s20 = sadd.s32 1, %s774_s17  ;;  %s26_s21 = sadd.s32 1, %s778_s18  ;;  %s782_s19 = sphi %s819_s19, %s14_s19   ;;  %s778_s18 = sphi %s817_s18, %s907_s18   ;;  %s774_s17 = sphi %s815_s17, %s906_s17   ;;  %s770_s16 = sphi %s813_s16, %s905_s16   ;;  %s766_s15 = sphi %s811_s15, %s904_s15  }
   0x4   : > { %p24_p0 = scmp.ge.s32.totalorder %s23_s20, 8  ;;  %p637_p1 = scmp.ge.s32.totalorder %s782_s19, 1 }
   0x5   : > { %p202_p2 = scmp.lt.s32.totalorder %s782_s19, 17 }
   0x6   : > { %s909_s20 = smov (%p24_p0, %s23_s20), 0  ;;  %s911_s21 = smov (!%p24_p0, %s26_s21), %s778_s18 }
   0x7   : > { %p203_p3 = pnand %p637_p1, %p202_p2  ;;  %p28_p4 = scmp.ge.s32.totalorder %s911_s21, 2 }
   0x8   : > { %v738_v0 = vld [vmem:[%s901_s2 + $0x8] sm:$0xff] (!%p203_p3)   ;;  %v784_v1 = vmov (!%p203_p3), 0.0   ;;  %v739_v2 = vld [vmem:[%s901_s2] sm:$0xff] (!%p203_p3)   ;;  %vm785_vm0 = vmmov (!%p203_p3), 0   ;;  %p245_p5 = scmp.lt.s32.totalorder (!%p203_p3), %s770_s16, 1  ;;  %p247_p6 = scmp.lt.s32.totalorder (!%p203_p3), %s766_s15, 8 }
   0x9   : > { %s913_s21 = smov (%p28_p4, %s911_s21), 0  ;;  %206 = sbr.rel (%p203_p3) target bundleno = 259 (0x103), region = 36 }
   0xa   : > { %671 = vmatprep.subr.bf16.mxu0 (!%p203_p3), %v784_v1  ;;  %677 = vmatprep.subr.bf16.mxu1 (!%p203_p3), %v784_v1  ;;  %s254_s26 = sadd.s32 (!%p203_p3), 1, %s766_s15  ;;  %vm299_vm1 = vcmask (!%p203_p3), 130048   ;;  %v743_v3 = vld [vmem:[%s901_s2 + $0x18] sm:$0xff] (!%p203_p3)   ;;  %v742_v10 = vld [vmem:[%s901_s2 + $0x10] sm:$0xff] (!%p203_p3)   ;;  %p267_p8 = scmp.lt.s32.totalorder (!%p203_p3), %s766_s15, 7  ;;  %vm521_vm2 = vcmask (!%p203_p3), 261120  }
   0xb   : > { %672 = vmatpush3.bf16.msra.mxu0 (!%p203_p3), %v738_v0  ;;  %679 = vmatprep.mubr.msk.bf16.mxu1 (!%p203_p3), %vm785_vm0, %v784_v1  ;;  %p257_p7 = scmp.lt.s32.totalorder (!%p203_p3), %s254_s26, 8  ;;  %v660_v34 = vld [vmem:[%s902_s3] ss:$0 sm:$0xff] (!%p203_p3) }
   0xc   : > { %678 = vmatpush3.bf16.msra.mxu1 (!%p203_p3), %v739_v2  ;;  %673 = vmatprep.mubr.msk.bf16.mxu0 (!%p203_p3), %vm785_vm0, %v784_v1 }
   0xd   : > { %683 = vmatprep.subr.bf16.mxu0 (!%p203_p3), %v784_v1  ;;  %689 = vmatprep.subr.bf16.mxu1 (!%p203_p3), %v784_v1 }
  0x10   : > { %s915_s16 = smov (!%p245_p5, %s770_s16), 1  ;;  %s917_s26 = smov (!%p257_p7, %s254_s26), 8 }
  0x11   : > { %s248_s27 = scalar_select %p247_p6, %s766_s15, 8 }
  0x12   : > { %s695_s28 = smul.u32 18, %s915_s16  ;;  %s640_s11 = sshll.u32 %s917_s26, 1 }
  0x13   : > { %s638_s29 = sshll.u32 %s248_s27, 1  ;;  %s919_s15 = smov (!%p267_p8, %s766_s15), 7 }
  0x14   : > { %s251_s30 = sadd.s32 %s695_s28, %s638_s29  ;;  %s261_s12 = sadd.s32 %s695_s28, %s640_s11 }
  0x15   : > { %s639_s5 = sshll.u32 %s251_s30, 2  ;;  %s641_s13 = sshll.u32 %s261_s12, 2 }
  0x16   : > { %s253_s10 = scalar_lea.vmem %s899_s0, %s639_s5  ;;  %s263_s23 = scalar_lea.vmem %s900_s1, %s641_s13 }
  0x17   : > { %v274_v4 = vld [vmem:[%s253_s10] sm:$0xf]  ;;  %v277_v5 = vld [vmem:[%s253_s10 + $0x4] sm:$0x1]  ;;  %s642_s26 = sshll.u32 %s915_s16, 3 }
  0x18   : > { %v646_v6 = vcombine.low %v274_v4, %v277_v5  ;;  %680 = vmatmul.mubr.msk.bf16.vlgmr.msra.gmra.mrb[0].mxu1 %vm299_vm1, %v274_v4  ;;  %v741_v11 = vld [vmem:[%s263_s23] sm:$0x1f]   ;;  %s270_s27 = sadd.s32 %s642_s26, %s919_s15 }
  0x19   : > { %690 = vmatpush3.bf16.msra.mxu1 %v743_v3  ;;  %691 = vmatprep.mubr.msk.bf16.mxu1 %vm785_vm0, %v784_v1  ;;  %v457_v13 = vshrl.u32 %v741_v11, 16  ;;  %v459_v14 = vshll.u32 %v741_v11, 16  ;;  %v392_v17 = vld [vmem:[%s263_s23] sm:$0xf]  ;;  %s643_s28 = sshll.u32 %s270_s27, 3 }
  0x1a   : > { %v287_v7 = vshrl.u32 %v646_v6, 16  ;;  %v289_v8 = vshll.u32 %v646_v6, 16  ;;  %s272_s16 = scalar_lea.vmem %s903_s4, %s643_s28 }
  0x1b   : > { %v461_v15 = vrot.slane %v459_v14, 1 }
  0x1c   : > { %v291_v9 = vrot.slane %v289_v8, 1 }
  0x1d   : > { %v462_v16 = vor.u32 %v461_v15, %v457_v13 }
  0x1e   : > { %v292_v12 = vor.u32 %v291_v9, %v287_v7 }
  0x20   : > { %674 = vmatmul.mubr.msk.bf16.vlgmr.msra.gmra.mrb[0].mxu0 %vm299_vm1, %v292_v12  ;;  %692 = vmatmul.mubr.msk.bf16.vlgmr.msra.gmra.mrb[4].mxu1 %vm299_vm1, %v462_v16 }
  0x21   : > { %684 = vmatpush3.bf16.msra.mxu0 %v742_v10  ;;  %685 = vmatprep.mubr.msk.bf16.mxu0 %vm785_vm0, %v784_v1 }
  0x28   : > { %686 = vmatmul.mubr.msk.bf16.vlgmr.msra.gmra.mrb[4].mxu0 %vm299_vm1, %v392_v17 }
  0xeb   : > { %v386_v18 = vpop.f32.mrb[0].mxu1 }
  0xec   : > { %v681_v19 = vpop.f32.mrb[1].mxu1 }
  0xed   : > { %v389_v20 = vpop.f32.mrb[2].mxu1 }
  0xee   : > { %v682_v21 = vpop.f32.mrb[3].mxu1 }
  0xf3   : > { %v337_v22 = vpop.f32.mrb[0].mxu0  ;;  %v506_v27 = vpop.f32.mrb[4].mxu1 }
  0xf4   : > { %v387_v23 = vadd.f32 %v386_v18, %v337_v22  ;;  %v675_v24 = vpop.f32.mrb[1].mxu0  ;;  %v693_v28 = vpop.f32.mrb[5].mxu1 }
  0xf5   : > { %v340_v25 = vpop.f32.mrb[2].mxu0  ;;  %v509_v29 = vpop.f32.mrb[6].mxu1 }
  0xf6   : > { %v676_v26 = vpop.f32.mrb[3].mxu0  ;;  %v694_v31 = vpop.f32.mrb[7].mxu1 }
  0xfb   : > { %v439_v30 = vpop.f32.mrb[4].mxu0 }
  0xfc   : > { %v445_v32 = vadd.f32 %v439_v30, %v387_v23  ;;  %v687_v33 = vpop.f32.mrb[5].mxu0 }
  0xfd   : > { %v442_v35 = vpop.f32.mrb[6].mxu0 }
  0xfe   : > { %v512_v36 = vadd.f32 %v506_v27, %v445_v32  ;;  %v688_v37 = vpop.f32.mrb[7].mxu0 }
 0x100   : > { %v520_v38 = vadd.f32 %v660_v34, %v512_v36 }
 0x102   : > { %522 = vst.msk [vmem:[%s272_s16] sm:$0xff] %vm521_vm2, %v520_v38 }
 0x103 PF: > { %s14_s19 = sadd.s32 1, %s782_s19   ;;  %s904_s15 = smov %s774_s17 }
 0x104   : > { %p11_p9 = scmp.ge.s32.totalorder %s14_s19, 18   ;;  %s905_s16 = smov %s778_s18 }
 0x105   : > { %s906_s17 = smov %s909_s20  ;;  %s907_s18 = smov %s913_s21 }
 0x106   :  { %13 = sbr.rel (!%p11_p9) target bundleno = 3 (0x3), region = 72 }

</bundles_post_ra>
